<compile_context>
chip_gen: v7x
topology: tpu7x:2x2x1
jax: 0.10.0
libtpu: 0.0.40
codegen_flags: <defaults>
</compile_context>

<pallas_src>
import functools

import jax
import jax.numpy as jnp
from jax import lax
from jax.experimental import pallas as pl
from jax.experimental.pallas import tpu as pltpu


_MIB = 1024 * 1024
DEFAULT_VMEM_LIMIT = 32 * _MIB   # scoped-VMEM default; safe on v5e/v6e/v7x
FUSED_VMEM_BUDGET = 24 * _MIB    # keep the fused working set <= ~24 MiB (v7x guidance)
TILE_TARGET_BYTES = 2 * _MIB     # ~1-4 MiB blocks -> near HBM roofline, low step overhead


def _round_up(x, m):
    return (x + m - 1) // m * m


# ----------------------------------------------------------------------------
# Shared helper: k-tap 1D conv over channels (zero padding) + sigmoid.
# `y` is the (C, 1) per-channel mean (C on sublanes).  The shifted-adds use
# pltpu.roll on the sublane axis (XLU) + edge masks, exactly matching
# nn.Conv1d(1, 1, k, padding=(k-1)//2, bias=False) over the channel axis.
# NOTE: assumes the full channel axis lives in one block (never tile C).
# ----------------------------------------------------------------------------
def _channel_conv_sigmoid(y, w_ref, k_size):
    C = y.shape[0]
    pad = (k_size - 1) // 2
    ch = lax.broadcasted_iota(jnp.int32, (C, 1), 0)
    z = jnp.zeros_like(y)
    for j in range(k_size):
        d = j - pad
        if d == 0:
            shifted = y
        else:
            # shifted[c] = y[c + d], zero at the channel edges.
            shifted = pltpu.roll(y, shift=(-d) % C, axis=0)   # positive axis (sublanes)
            valid = (ch + d >= 0) & (ch + d < C)
            shifted = jnp.where(valid, shifted, 0.0)
        z = z + w_ref[j] * shifted                            # w_ref[j]: SMEM scalar tap
    return jax.nn.sigmoid(z)                                   # EUP


# ----------------------------------------------------------------------------
# Fused kernel (small/medium slabs): one grid step per image.
# Reads the (C, HW) slab once, computes the gate, writes the gated slab once.
# ----------------------------------------------------------------------------
def _eca_fused_kernel(w_ref, x_ref, o_ref, *, k_size, hw_total):
    xb = x_ref[0]                                                    # (C, HW), native dtype
    y = jnp.sum(xb.astype(jnp.float32), axis=-1, keepdims=True) * (1.0 / float(hw_total))
    g = _channel_conv_sigmoid(y, w_ref, k_size)                      # (C, 1) f32
    o_ref[0] = xb * g.astype(xb.dtype)                               # lane-broadcast gate


# ----------------------------------------------------------------------------
# Tiled path, kernel 1: global average pool (tiled reduction over HW) -> conv -> sigmoid.
# acc_ref: (C, 128) f32 partial sums (VPU adds per step, one XLU reduce in finalize).
# ----------------------------------------------------------------------------
def _eca_gate_kernel(w_ref, x_ref, g_ref, acc_ref, *, k_size, hw_total, mask_tail):
    hw_i = pl.program_id(1)

    @pl.when(hw_i == 0)
    def _init():
        acc_ref[...] = jnp.zeros_like(acc_ref)

    xb = x_ref[0].astype(jnp.float32)                                # (C, t_hw), t_hw % 128 == 0
    t_hw = xb.shape[-1]
    if mask_tail:                                                    # partial last HW tile
        lane = lax.broadcasted_iota(jnp.int32, xb.shape, 1)
        xb = jnp.where(hw_i * t_hw + lane < hw_total, xb, 0.0)

    part = acc_ref[...]
    for f in range(t_hw // 128):                                     # lane-folded partial sums
        part = part + xb[:, f * 128:(f + 1) * 128]
    acc_ref[...] = part

    @pl.when(hw_i == pl.num_programs(1) - 1)
    def _finalize():
        y = jnp.sum(acc_ref[...], axis=-1, keepdims=True) * (1.0 / float(hw_total))  # (C, 1)
        g_ref[0] = _channel_conv_sigmoid(y, w_ref, k_size)


# ----------------------------------------------------------------------------
# Tiled path, kernel 2: out = x * gate (fully parallel; lane-dense stores).
# OOB lanes of a partial last tile are dropped by Pallas on write-back.
# ----------------------------------------------------------------------------
def _eca_apply_kernel(x_ref, g_ref, o_ref):
    xb = x_ref[0]                                                    # (C, t_hw)
    o_ref[0] = xb * g_ref[0].astype(xb.dtype)                        # gate (C, 1) broadcast


# ----------------------------------------------------------------------------
# Wrapper
# ----------------------------------------------------------------------------
def eca_forward(x_nchw, w_eca, *, max_hw_tile=None, force_tiled=False):
    """ECA forward.  x_nchw: (N, C, H, W), w_eca: (k,) Conv1d taps.  Returns (N, C, H, W)."""
    N, C, H, W = x_nchw.shape
    HW = H * W
    k_size = int(w_eca.shape[0])
    w_f32 = w_eca.astype(jnp.float32)

    # Free (N, C, HW) view of the contiguous NCHW input -- no transposes.
    x3d = x_nchw.reshape(N, C, HW)
    itemsize = jnp.dtype(x3d.dtype).itemsize
    slab_bytes = C * HW * itemsize

    # Fused path if (double-buffered in + out blocks + f32 intermediates) fit the budget.
    fused_ok = (not force_tiled) and (4 * slab_bytes + 2 * C * HW * 4 <= FUSED_VMEM_BUDGET)

    if fused_ok:
        # NOTE(perf): for N == 1 on v7x a 2-way HW split across TensorCores would help;
        # not implemented here (N axis is the only parallel axis of this call).
        out3d = pl.pallas_call(
            functools.partial(_eca_fused_kernel, k_size=k_size, hw_total=HW),
            out_shape=jax.ShapeDtypeStruct((N, C, HW), x3d.dtype),
            grid=(N,),
            in_specs=[
                pl.BlockSpec(memory_space=pltpu.MemorySpace.SMEM),     # conv taps (k,)
                pl.BlockSpec((1, C, HW), lambda n: (n, 0, 0)),         # whole image slab
            ],
            out_specs=pl.BlockSpec((1, C, HW), lambda n: (n, 0, 0)),
            compiler_params=pltpu.CompilerParams(
                dimension_semantics=("parallel",),
                vmem_limit_bytes=DEFAULT_VMEM_LIMIT,
            ),
            cost_estimate=pl.CostEstimate(
                flops=int(2 * N * HW * C + 3 * N * C * k_size),
                transcendentals=int(N * C),
                bytes_accessed=int(2 * N * HW * C * itemsize + k_size * 4),
            ),
        )(w_f32, x3d)
        return out3d.reshape(N, C, H, W)

    # ---------------- tiled two-kernel fallback (large slabs) ----------------
    t_hw = TILE_TARGET_BYTES // (C * itemsize)
    t_hw = max(128, (t_hw // 128) * 128)          # multiple of 128 (lane-dense)
    t_hw = min(t_hw, 8192)                        # cap the unrolled lane folds
    t_hw = min(t_hw, _round_up(HW, 128))          # never exceed (rounded-up) HW
    if max_hw_tile is not None:
        t_hw = min(t_hw, max(128, (int(max_hw_tile) // 128) * 128))
    n_hw = pl.cdiv(HW, t_hw)
    mask_tail = (HW % t_hw) != 0

    gate = pl.pallas_call(
        functools.partial(_eca_gate_kernel, k_size=k_size, hw_total=HW, mask_tail=mask_tail),
        out_shape=jax.ShapeDtypeStruct((N, C, 1), jnp.float32),
        grid=(N, n_hw),
        in_specs=[
            pl.BlockSpec(memory_space=pltpu.MemorySpace.SMEM),          # conv taps (k,)
            pl.BlockSpec((1, C, t_hw), lambda n, h: (n, 0, h)),         # x tiles
        ],
        out_specs=pl.BlockSpec((1, C, 1), lambda n, h: (n, 0, 0)),      # resident over HW axis
        scratch_shapes=[pltpu.VMEM((C, 128), jnp.float32)],             # per-lane partial sums
        compiler_params=pltpu.CompilerParams(
            dimension_semantics=("parallel", "arbitrary"),              # HW = reduction, last
            vmem_limit_bytes=DEFAULT_VMEM_LIMIT,
        ),
        cost_estimate=pl.CostEstimate(
            flops=int(N * HW * C + 3 * N * C * k_size),
            transcendentals=int(N * C),
            bytes_accessed=int(N * HW * C * itemsize + N * C * 4 + k_size * 4),
        ),
    )(w_f32, x3d)

    out3d = pl.pallas_call(
        _eca_apply_kernel,
        out_shape=jax.ShapeDtypeStruct((N, C, HW), x3d.dtype),
        grid=(N, n_hw),
        in_specs=[
            pl.BlockSpec((1, C, t_hw), lambda n, h: (n, 0, h)),
            pl.BlockSpec((1, C, 1), lambda n, h: (n, 0, 0)),
        ],
        out_specs=pl.BlockSpec((1, C, t_hw), lambda n, h: (n, 0, h)),
        compiler_params=pltpu.CompilerParams(
            dimension_semantics=("parallel", "parallel"),
            vmem_limit_bytes=DEFAULT_VMEM_LIMIT,
        ),
        cost_estimate=pl.CostEstimate(
            flops=int(N * HW * C),
            transcendentals=0,
            bytes_accessed=int(2 * N * HW * C * itemsize + N * C * 4),
        ),
    )(x3d, gate)

    return out3d.reshape(N, C, H, W)


# ----------------------------------------------------------------------------
# Pure-JAX reference (mirrors the PyTorch eca_layer forward)
# ----------------------------------------------------------------------------
def eca_reference(x_nchw, w_eca):
    N, C, H, W = x_nchw.shape
    k = int(w_eca.shape[0])
    pad = (k - 1) // 2
    y = jnp.mean(x_nchw.astype(jnp.float32), axis=(2, 3))             # adaptive avg pool -> (N, C)
    ypad = jnp.pad(y, ((0, 0), (pad, pad)))
    z = sum(w_eca[j].astype(jnp.float32) * ypad[:, j:j + C] for j in range(k))
    g = jax.nn.sigmoid(z)
    return (x_nchw.astype(jnp.float32) * g[:, :, None, None]).astype(x_nchw.dtype)


if __name__ == "__main__":
    key = jax.random.PRNGKey(0)
    k1, k2, k3, k4 = jax.random.split(key, 4)

    # Case 1: fused single-pass kernel.  N=2, C=128, 16x16 spatial, k_size=3.
    N, C, H, W = 2, 128, 16, 16
    x = jax.random.normal(k1, (N, C, H, W), jnp.float32)
    w = 0.5 * jax.random.normal(k2, (3,), jnp.float32)
    out = jax.block_until_ready(eca_forward(x, w))
    ref = eca_reference(x, w)
    assert out.shape == x.shape
    assert jnp.allclose(out, ref, atol=1e-4, rtol=1e-4), "fused ECA output mismatch vs reference"

    # Case 2: tiled two-kernel path (forced) with a non-divisible HW (18*18 = 324) and
    # k_size=5 -- exercises the cdiv grid, masked tail, accumulator init/finalize path.
    N2, C2, H2, W2 = 1, 96, 18, 18
    x2 = jax.random.normal(k3, (N2, C2, H2, W2), jnp.float32)
    w2 = 0.5 * jax.random.normal(k4, (5,), jnp.float32)
    out2 = jax.block_until_ready(eca_forward(x2, w2, force_tiled=True, max_hw_tile=128))
    ref2 = eca_reference(x2, w2)
    assert out2.shape == x2.shape
    assert jnp.allclose(out2, ref2, atol=1e-4, rtol=1e-4), "tiled ECA output mismatch vs reference"

    print("KERNEL_OK")
</pallas_src>

<mosaic_0001>
module attributes {stable_mosaic.version = 11 : i64} {
  func.func @_eca_fused_kernel(%arg0: i32, %arg1: memref<3xf32, #tpu.memory_space<smem>>, %arg2: memref<1x128x256xf32, #tpu.memory_space<vmem>>, %arg3: memref<1x128x256xf32, #tpu.memory_space<vmem>>) attributes {dimension_semantics = [#tpu.dimension_semantics<parallel>], iteration_bounds = array<i64: 2>, scalar_prefetch = 0 : i64, scratch_operands = 0 : i64, tpu.core_type = #tpu.core_type<tc>, window_params = [{transform_indices = @transform_0, window_bounds = array<i64: 3>}, {transform_indices = @transform_1, window_bounds = array<i64: 1, 128, 256>}, {transform_indices = @transform_2, window_bounds = array<i64: 1, 128, 256>}]} {
    %c0 = arith.constant 0 : index
    %c0_0 = arith.constant 0 : index
    %c0_1 = arith.constant 0 : index
    %0 = vector.load %arg2[%c0, %c0_0, %c0_1] : memref<1x128x256xf32, #tpu.memory_space<vmem>>, vector<1x128x256xf32>
    %1 = vector.shape_cast %0 : vector<1x128x256xf32> to vector<128x256xf32>
    %cst = arith.constant dense<0.000000e+00> : vector<128xf32>
    %2 = vector.multi_reduction <add>, %1, %cst [1] : vector<128x256xf32> to vector<128xf32>
    %3 = vector.shape_cast %2 : vector<128xf32> to vector<128x1xf32>
    %cst_2 = arith.constant 3.906250e-03 : f32
    %4 = vector.broadcast %cst_2 : f32 to vector<128x1xf32>
    %5 = arith.mulf %3, %4 : vector<128x1xf32>
    %6 = tpu.iota {dimensions = array<i32: 0>} : vector<128x1xi32>
    %cst_3 = arith.constant 0.000000e+00 : f32
    %7 = vector.broadcast %cst_3 : f32 to vector<128x1xf32>
    %c1_i32 = arith.constant 1 : i32
    %8 = tpu.dynamic_rotate %5 by %c1_i32 dim 0 : vector<128x1xf32>, i32 -> vector<128x1xf32>
    %c-1_i32 = arith.constant -1 : i32
    %9 = vector.broadcast %c-1_i32 : i32 to vector<128x1xi32>
    %10 = arith.addi %6, %9 : vector<128x1xi32>
    %c0_i32 = arith.constant 0 : i32
    %11 = vector.broadcast %c0_i32 : i32 to vector<128x1xi32>
    %12 = arith.cmpi sge, %10, %11 : vector<128x1xi32>
    %c-1_i32_4 = arith.constant -1 : i32
    %13 = vector.broadcast %c-1_i32_4 : i32 to vector<128x1xi32>
    %14 = arith.addi %6, %13 : vector<128x1xi32>
    %c128_i32 = arith.constant 128 : i32
    %15 = vector.broadcast %c128_i32 : i32 to vector<128x1xi32>
    %16 = arith.cmpi slt, %14, %15 : vector<128x1xi32>
    %17 = arith.andi %12, %16 : vector<128x1xi1>
    %cst_5 = arith.constant 0.000000e+00 : f32
    %18 = vector.broadcast %cst_5 : f32 to vector<128x1xf32>
    %19 = arith.select %17, %8, %18 : vector<128x1xi1>, vector<128x1xf32>
    %c0_6 = arith.constant 0 : index
    %20 = memref.load %arg1[%c0_6] : memref<3xf32, #tpu.memory_space<smem>>
    %21 = vector.broadcast %20 : f32 to vector<128x1xf32>
    %22 = arith.mulf %21, %19 : vector<128x1xf32>
    %23 = arith.addf %7, %22 : vector<128x1xf32>
    %c1 = arith.constant 1 : index
    %24 = memref.load %arg1[%c1] : memref<3xf32, #tpu.memory_space<smem>>
    %25 = vector.broadcast %24 : f32 to vector<128x1xf32>
    %26 = arith.mulf %25, %5 : vector<128x1xf32>
    %27 = arith.addf %23, %26 : vector<128x1xf32>
    %c127_i32 = arith.constant 127 : i32
    %28 = tpu.dynamic_rotate %5 by %c127_i32 dim 0 : vector<128x1xf32>, i32 -> vector<128x1xf32>
    %c1_i32_7 = arith.constant 1 : i32
    %29 = vector.broadcast %c1_i32_7 : i32 to vector<128x1xi32>
    %30 = arith.addi %6, %29 : vector<128x1xi32>
    %c0_i32_8 = arith.constant 0 : i32
    %31 = vector.broadcast %c0_i32_8 : i32 to vector<128x1xi32>
    %32 = arith.cmpi sge, %30, %31 : vector<128x1xi32>
    %c1_i32_9 = arith.constant 1 : i32
    %33 = vector.broadcast %c1_i32_9 : i32 to vector<128x1xi32>
    %34 = arith.addi %6, %33 : vector<128x1xi32>
    %c128_i32_10 = arith.constant 128 : i32
    %35 = vector.broadcast %c128_i32_10 : i32 to vector<128x1xi32>
    %36 = arith.cmpi slt, %34, %35 : vector<128x1xi32>
    %37 = arith.andi %32, %36 : vector<128x1xi1>
    %cst_11 = arith.constant 0.000000e+00 : f32
    %38 = vector.broadcast %cst_11 : f32 to vector<128x1xf32>
    %39 = arith.select %37, %28, %38 : vector<128x1xi1>, vector<128x1xf32>
    %c2 = arith.constant 2 : index
    %40 = memref.load %arg1[%c2] : memref<3xf32, #tpu.memory_space<smem>>
    %41 = vector.broadcast %40 : f32 to vector<128x1xf32>
    %42 = arith.mulf %41, %39 : vector<128x1xf32>
    %43 = arith.addf %27, %42 : vector<128x1xf32>
    %44 = arith.negf %43 : vector<128x1xf32>
    %45 = math.exp %44 : vector<128x1xf32>
    %cst_12 = arith.constant 1.000000e+00 : f32
    %46 = vector.broadcast %cst_12 : f32 to vector<128x1xf32>
    %47 = arith.addf %46, %45 : vector<128x1xf32>
    %48 = arith.divf %46, %47 : vector<128x1xf32>
    %49 = vector.broadcast %48 : vector<128x1xf32> to vector<128x256xf32>
    %50 = arith.mulf %1, %49 : vector<128x256xf32>
    %c0_13 = arith.constant 0 : index
    %c0_14 = arith.constant 0 : index
    %c0_15 = arith.constant 0 : index
    %51 = vector.load %arg3[%c0_13, %c0_14, %c0_15] : memref<1x128x256xf32, #tpu.memory_space<vmem>>, vector<1x128x256xf32>
    %52 = vector.shape_cast %51 : vector<1x128x256xf32> to vector<128x256xf32>
    %53 = vector.shape_cast %50 : vector<128x256xf32> to vector<1x128x256xf32>
    tpu.vector_store %arg3[%c0_13, %c0_14, %c0_15], %53 {strides = array<i32>} : memref<1x128x256xf32, #tpu.memory_space<vmem>>, vector<1x128x256xf32>,
    return
  }
  func.func @transform_0(%arg0: i32) -> i32 {
    %c0_i32 = arith.constant 0 : i32
    %c0_i32_0 = arith.constant 0 : i32
    return %c0_i32 : i32
  }
  func.func @transform_1(%arg0: i32) -> (i32, i32, i32) {
    %c0_i32 = arith.constant 0 : i32
    %c0_i32_0 = arith.constant 0 : i32
    %c0_i32_1 = arith.constant 0 : i32
    return %arg0, %c0_i32, %c0_i32_0 : i32, i32, i32
  }
  func.func @transform_2(%arg0: i32) -> (i32, i32, i32) {
    %c0_i32 = arith.constant 0 : i32
    %c0_i32_0 = arith.constant 0 : i32
    %c0_i32_1 = arith.constant 0 : i32
    return %arg0, %c0_i32, %c0_i32_0 : i32, i32, i32
  }
}

</mosaic_0001>

<bundles_post_ra>
// kernel: tpu_custom_call.1
= control target key start
LH: loop header
LB: loop body
LE: loop exit
PB: predicated region body
PF: predicated region fallthrough
CT: control target
= control target key end

     0   :  { %7 = vsyncpa [#allocation5], 0  ;;  %s1840_s0 = inlined_call_operand.hbm [shape: f32[3], index: 0, kind: input, shape index: {}]   ;;  %s1841_s1 = inlined_call_operand.hbm [shape: f32[2,128,256], index: 1, kind: input, shape index: {}]   ;;  %s1842_s2 = inlined_call_operand.hbm [shape: f32[2,128,256], index: 2, kind: output, shape index: {}]  }
   0x1   :  { %8 = vsyncpa [#allocation3], 0 }
   0x2   :  { %10 = vsyncpa [#allocation3 + $0x1], 0 }
   0x3   :  { %11 = vsyncpa [#allocation4], 0 }
   0x4   :  { %13 = vsyncpa [#allocation4 + $0x1], 0  ;;  %s1256_s9 = smov 0   ;;  %s1258_s10 = smov 0  }
   0x5   :  { %s1260_s11 = smov 0   ;;  %s1262_s12 = smov 0  }
   0x6 LB: > { %s1277_s13 = sadd.s32 4294967295, %s1231_s12   ;;  %s954_s14 = sadd.s32 4294967294, %s1231_s12   ;;  %s1231_s12 = sphi %s1262_s12, %s1887_s12   ;;  %s1227_s11 = sphi %s1260_s11, %s1886_s11   ;;  %s1223_s10 = sphi %s1258_s10, %s1885_s10   ;;  %s1219_s9 = sphi %s1256_s9, %s1884_s9  }
   0x7   : > { %s1281_s15 = sadd.s32 1, %s1231_s12   ;;  %s47_s16 = sadd.s32 1, %s1227_s11 }
   0x8   : > { %s44_s17 = ssub.s32 %s1231_s12, %s1281_s15  ;;  %p54_p0 = scmp.ne.s32.totalorder %s1227_s11, %s1223_s10 }
   0x9   : > { %p45_p1 = scmp.eq.s32.totalorder %s44_s17, 0  ;;  %p55_p2 = scmp.eq.s32.totalorder %s1231_s12, 0 }
   0xa   : > { %p60_p3 = scmp.ne.s32.totalorder %s1223_s10, %s1219_s9  ;;  %p1843_p4 = scmp.eq.s32.totalorder %s1277_s13, 0 }
   0xb   : > { %s1293_s18 = scalar_select %p45_p1, %s1227_s11, %s47_s16  }
   0xc   : > { %p1295_p5 = por %p55_p2, %p54_p0  ;;  %p1301_p6 = por %p1843_p4, %p60_p3 }
   0xd   : > { %p84_p7 = scmp.eq.s32.totalorder %s1277_s13, 1  ;;  %p90_p8 = scmp.eq.s32.totalorder %s954_s14, 1 }
   0xe   : > { %s1856_s20 = scalar_select %p1301_p6, 1, 0 }
   0xf   : > { %p955_p9 = scmp.ge.s32.totalorder %s1231_s12, 1  ;;  %p97_p10 = scmp.lt.s32.totalorder %s1231_s12, 3 }
  0x10   : > { %p1308_p11 = por %p84_p7, %p54_p0  ;;  %p1312_p12 = por %p90_p8, %p60_p3 }
  0x11   : > { %p1316_p13 = pnand %p955_p9, %p97_p10  ;;  %p1011_p4 = scmp.lt.s32.totalorder %s1231_s12, 2 }
  0x12   : > { %s1857_s21 = scalar_select %p1308_p11, 1, 0 }
  0x13   : > { %s1858_s22 = scalar_select %p1312_p12, 1, 0 }
  0x14   : > { %p998_p2 = pneg %p1316_p13  ;;  %s119_s24 = sand.u32 1, %s1227_s11  }
  0x15   : > { %s988_s25 = sshll.u32 %s1231_s12, 12  ;;  %p1860_p6 = scmp.eq.s32.totalorder %s1277_s13, 0 }
  0x16   : > { %p1330_p7 = pnand %p1011_p4, %p1295_p5  ;;  %s958_s27 = sshll.u32 %s119_s24, 8 }
  0x17   : > { %p999_p0 = pnand %p998_p2, %p1860_p6  ;;  %s1118_s30 = scalar_lea.hbm %s1840_s0, 16 }
  0x18   : > { %p1119_p3 = scmp.ne.s32.totalorder %s1840_s0, %s1118_s30  ;;  %p1125_p6 = scmp.lt.u32.totalorder %s1118_s30, %s1840_s0 }
  0x19   : > { %p1120_p8 = pneg %p999_p0 }
  0x1b   : > { %p1121_p9 = pnand %p1120_p8, %p1119_p3 }
  0x1d   : > { %p1122_p10 = pneg %p1121_p9 }
  0x1f   : > { %p1127_p4 = pnand %p1125_p6, %p1122_p10 }
  0x21   : > { %1130 = shalt.err (!%p1127_p4)
}
  0x22   : > { %s1233_s7 = smov [#allocation2]   ;;  %s1349_s19 = scalar_lea.hbm %s1841_s1, %s988_s25 }
  0x23   : > { %1001 = dma.hbm_to_smem (!%p999_p0), %s1840_s0, 16, %s1233_s7, [#allocation5]  }
  0x24   : > { %s123_s28 = scalar_lea.vmem [#allocation6], %s958_s27  ;;  %s1353_s30 = scalar_lea.sflag [#allocation3], %s119_s24 }
  0x25   : > { %s130_s29 = sshll.u32 %s123_s28, 4  ;;  %s1131_s3 = scalar_lea.hbm %s1349_s19, 4096  ;;  %s1351_s29 = int_to_ptr.vmem [resolvable:$true] %s130_s29 }
  0x26   : > { %p1132_p5 = scmp.ne.s32.totalorder %s1349_s19, %s1131_s3  ;;  %p1133_p2 = pneg %p1330_p7 }
  0x27   : > { %s1136_s5 = scalar_lea.hbm %s1841_s1, 8192  ;;  %p1137_p8 = scmp.lt.u32.totalorder %s1349_s19, %s1841_s1 }
  0x28   : > { %p1134_p0 = pnand %p1133_p2, %p1132_p5  ;;  %p1138_p9 = scmp.lt.u32.totalorder %s1136_s5, %s1131_s3 }
  0x29   : > { %p1140_p6 = scmp.lt.u32.totalorder %s1131_s3, %s1349_s19 }
  0x2a   : > { %p1135_p3 = pneg %p1134_p0  ;;  %p1139_p10 = por %p1138_p9, %p1137_p8 }
  0x2c   : > { %p1141_p4 = por %p1140_p6, %p1139_p10 }
  0x2e   : > { %p1142_p1 = pnand %p1141_p4, %p1135_p3 }
  0x30   : > { %1145 = shalt.err (!%p1142_p1)
}
  0x31   : > { %s1146_s24 = scalar_lea.vmem %s1351_s29, 4096  ;;  %s1234_s27 = smov [#allocation6]  }
  0x32   : > { %p1147_p5 = scmp.ne.s32.totalorder %s1351_s29, %s1146_s24  ;;  %s1151_s8 = sshll.u32 %s1234_s27, 4  ;;  %s1152_s8 = int_to_ptr.vmem [resolvable:$false] %s1151_s8 }
  0x33   : > { %s1153_s14 = scalar_lea.vmem %s1152_s8, 8192  ;;  %p1154_p11 = scmp.lt.s32.totalorder %s1351_s29, %s1152_s8 }
  0x34   : > { %p1149_p0 = pnand %p1147_p5, %p1133_p2  ;;  %p1155_p8 = scmp.lt.s32.totalorder %s1153_s14, %s1146_s24 }
  0x36   : > { %p1150_p12 = pneg %p1149_p0  ;;  %p1156_p9 = por %p1155_p8, %p1154_p11 }
  0x38   : > { %p1157_p10 = pnand %p1156_p9, %p1150_p12 }
  0x3a   : > { %1160 = shalt.err (!%p1157_p10)
}
  0x3b   : > { %s1235_s16 = smov 256   ;;  %s1236_s17 = smov 16  }
  0x3c   : > { %1005 = dma.hbm_to_vmem [thread:$0]  (!%p1330_p7), %s1349_s19, 4096, %s1351_s29, %s1353_s30, %s1235_s16, %s1235_s16, %s1236_s17  }
  0x3d   : > { %142 = sbr.rel (%p1316_p13) target bundleno = 458 (0x1ca), region = 28 }
  0x44   : > { %p1862_p1 = scmp.eq.s32.totalorder %s1277_s13, 0 }
  0x46   : > { %1206 = dma.done.wait (%p1862_p1), [#allocation5], 16   ;;  %p1863_p2 = pmov %p1862_p1 }
  0x47   : > { %s1388_s28 = sand.u32 1, %s1223_s10   ;;  %p1864_p11 = scmp.ne.s32.totalorder %s1856_s20, 0 }
  0x48   : > { %1208 = vsyncadd (%p1863_p2), [#allocation5], 4294967280  ;;  %s963_s3 = sshll.u32 %s1388_s28, 8  ;;  %s149_s25 = scalar_lea.sflag [#allocation3], %s1388_s28 }
  0x49   : > { %s1394_s26 = scalar_lea.vmem [#allocation6], %s963_s3 }
  0x4a   : > { %1210 = dma.done.wait (%p1864_p11), %s149_s25, 4096  }
  0x4b   : > { %1212 = vsyncadd (%p1864_p11), %s149_s25, 4294963200 }
  0x4c   : > { %157 = sfence }
  0x4d   : > { %v1401_v0 = vld [vmem:[%s1394_s26 + $0x10] sm:$0xff]  ;;  %v1404_v1 = vld [vmem:[%s1394_s26 + $0x18] sm:$0xff]  ;;  %v1407_v2 = vld [vmem:[%s1394_s26] sm:$0xff]  ;;  %v1237_v48 = vmov 0   ;;  %v270_v49 = vlaneseq  ;;  %s400_s20 = sld [smem:[#allocation2]]  ;;  %s965_s23 = sld [smem:[#allocation2 + $0x1]] }
  0x4e   : > { %1865 = vst [vmem:[#allocation11_spill] sm:$0xff] %v1407_v2  ;;  %v209_v3 = vadd.f32 %v1404_v1, %v1401_v0  ;;  %v1412_v4 = vld [vmem:[%s1394_s26 + $0x8] sm:$0xff]  ;;  %v1415_v5 = vld [vmem:[%s1394_s26 + $0x20] sm:$0xff]  ;;  %v1423_v8 = vld [vmem:[%s1394_s26 + $0xf0] sm:$0xff]  ;;  %1052 = vset.pattern.permute.xlu1 %v1237_v48  ;;  %1053 = vset.pattern.permute.xlu0 %v1237_v48  ;;  %s966_s19 = sld [smem:[#allocation2 + $0x2]]  ;;  %s1725_s29 = scalar_lea.vmem [#allocation7], %s963_s3 }
  0x4f   : > { %1866 = vst [vmem:[#allocation12_spill] sm:$0xff] %v1412_v4  ;;  %v1418_v6 = vld [vmem:[%s1394_s26 + $0x28] sm:$0xff]  ;;  %v206_v7 = vadd.f32 %v1412_v4, %v1407_v2  ;;  %1867 = vst [vmem:[#allocation13_spill] sm:$0xff] %v1423_v8  ;;  %v1426_v9 = vld [vmem:[%s1394_s26 + $0xf8] sm:$0xff]  ;;  %v1528_v50 = vshrl.u32 %v270_v49, 7  ;;  %s989_s30 = sshll.u32 %s1277_s13, 12 }
  0x50   : > { %1868 = vst [vmem:[#allocation14_spill] sm:$0xff] %v1426_v9  ;;  %210 = vadd.xlane.f32.xlu1 %v209_v3  ;;  %v212_v10 = vadd.f32 %v1418_v6, %v1415_v5  ;;  %v251_v11 = vadd.f32 %v1426_v9, %v1423_v8  ;;  %v1433_v12 = vld [vmem:[%s1394_s26 + $0x40] sm:$0xff]  ;;  %v1436_v13 = vld [vmem:[%s1394_s26 + $0x48] sm:$0xff]  ;;  %v1439_v14 = vld [vmem:[%s1394_s26 + $0x30] sm:$0xff]  ;;  %s869_s4 = sshll.u32 %s1725_s29, 4  ;;  %s1790_s7 = scalar_lea.hbm %s1842_s2, %s989_s30  ;;  %s1792_s4 = int_to_ptr.vmem [resolvable:$true] %s869_s4 }
  0x51   : > { %207 = vadd.xlane.f32.xlu0 %v206_v7  ;;  %v1442_v15 = vld [vmem:[%s1394_s26 + $0x38] sm:$0xff]  ;;  %v218_v16 = vadd.f32 %v1436_v13, %v1433_v12  ;;  %v1449_v18 = vld [vmem:[%s1394_s26 + $0x60] sm:$0xff]  ;;  %v1452_v19 = vld [vmem:[%s1394_s26 + $0x68] sm:$0xff]  ;;  %vm303_vm0 = vcmp.lt.s32.totalorder %v1528_v50, 1  ;;  %vm484_vm1 = vcmp.lt.s32.totalorder %v1528_v50, 7  ;;  %s856_s13 = scalar_lea.sflag [#allocation4], %s1388_s28 }
  0x52   : > { %v215_v17 = vadd.f32 %v1442_v15, %v1439_v14  ;;  %v1455_v20 = vld [vmem:[%s1394_s26 + $0x50] sm:$0xff]  ;;  %v1458_v21 = vld [vmem:[%s1394_s26 + $0x58] sm:$0xff]  ;;  %v224_v22 = vadd.f32 %v1452_v19, %v1449_v18  ;;  %v1465_v24 = vld [vmem:[%s1394_s26 + $0x80] sm:$0xff]  ;;  %s1161_s24 = scalar_lea.vmem %s1792_s4, 4096  ;;  %p1881_p13 = scmp.ne.s32.totalorder %s1857_s21, 0 }
  0x53   : > { %v221_v23 = vadd.f32 %v1458_v21, %v1455_v20  ;;  %v1468_v25 = vld [vmem:[%s1394_s26 + $0x88] sm:$0xff]  ;;  %v1471_v26 = vld [vmem:[%s1394_s26 + $0x70] sm:$0xff]  ;;  %v1474_v27 = vld [vmem:[%s1394_s26 + $0x78] sm:$0xff]  ;;  %v1533_v56 = vstv %s400_s20  ;;  %p1162_p12 = scmp.ne.s32.totalorder %s1792_s4, %s1161_s24  ;;  %s1238_s27 = smov [#allocation7]  }
  0x54   : > { %213 = vadd.xlane.f32.xlu1 %v212_v10  ;;  %v230_v28 = vadd.f32 %v1468_v25, %v1465_v24  ;;  %v227_v29 = vadd.f32 %v1474_v27, %v1471_v26  ;;  %v1481_v30 = vld [vmem:[%s1394_s26 + $0xa0] sm:$0xff]  ;;  %v1484_v31 = vld [vmem:[%s1394_s26 + $0xa8] sm:$0xff]  ;;  %v1487_v32 = vld [vmem:[%s1394_s26 + $0x90] sm:$0xff]  ;;  %v1536_v61 = vstv %s965_s23  ;;  %s1165_s8 = sshll.u32 %s1238_s27, 4  ;;  %s1166_s8 = int_to_ptr.vmem [resolvable:$false] %s1165_s8 }
  0x55   : > { %252 = vadd.xlane.f32.xlu0 %v251_v11  ;;  %v1490_v33 = vld [vmem:[%s1394_s26 + $0x98] sm:$0xff]  ;;  %v236_v34 = vadd.f32 %v1484_v31, %v1481_v30  ;;  %v1497_v36 = vld [vmem:[%s1394_s26 + $0xc0] sm:$0xff]  ;;  %v1500_v37 = vld [vmem:[%s1394_s26 + $0xc8] sm:$0xff]  ;;  %p1163_p7 = pnand %p1162_p12, %p1881_p13  ;;  %s1167_s14 = scalar_lea.vmem %s1166_s8, 8192 }
  0x56   : > { %v233_v35 = vadd.f32 %v1490_v33, %v1487_v32  ;;  %v1503_v38 = vld [vmem:[%s1394_s26 + $0xb0] sm:$0xff]  ;;  %v1506_v39 = vld [vmem:[%s1394_s26 + $0xb8] sm:$0xff]  ;;  %v242_v40 = vadd.f32 %v1500_v37, %v1497_v36  ;;  %v1513_v42 = vld [vmem:[%s1394_s26 + $0xe0] sm:$0xff]  ;;  %p1168_p6 = scmp.lt.s32.totalorder %s1792_s4, %s1166_s8  ;;  %p1169_p4 = scmp.lt.s32.totalorder %s1167_s14, %s1161_s24 }
  0x57   : > { %v239_v41 = vadd.f32 %v1506_v39, %v1503_v38  ;;  %1869 = vst [vmem:[#allocation15_spill] sm:$0xff] %v1513_v42  ;;  %v1516_v43 = vld [vmem:[%s1394_s26 + $0xe8] sm:$0xff]  ;;  %v1519_v44 = vld [vmem:[%s1394_s26 + $0xd0] sm:$0xff]  ;;  %v1522_v45 = vld [vmem:[%s1394_s26 + $0xd8] sm:$0xff]  ;;  %p1164_p3 = pneg %p1163_p7 }
  0x58   : > { %219 = vadd.xlane.f32.xlu1 %v218_v16  ;;  %1870 = vst [vmem:[#allocation16_spill] sm:$0xff] %v1516_v43  ;;  %1871 = vst [vmem:[#allocation17_spill] sm:$0xff] %v1522_v45  ;;  %v248_v46 = vadd.f32 %v1516_v43, %v1513_v42  ;;  %v245_v47 = vadd.f32 %v1522_v45, %v1519_v44  ;;  %p1170_p5 = por %p1169_p4, %p1168_p6 }
  0x59   : > { %216 = vadd.xlane.f32.xlu0 %v215_v17  ;;  %v286_v17 = vadd.s32 120, %v1528_v50 }
  0x5a   : > { %p1171_p0 = pnand %p1170_p5, %p1164_p3 }
  0x5c   : > { %225 = vadd.xlane.f32.xlu1 %v224_v22  ;;  %v320_v22 = vadd.s32 4294967295, %v1528_v50 }
  0x5d   : > { %222 = vadd.xlane.f32.xlu0 %v221_v23 }
  0x5e   : > { %vm336_vm2 = vcmp.ge.s32.totalorder %v320_v22, 0 }
  0x60   : > { %231 = vadd.xlane.f32.xlu1 %v230_v28 }
  0x61   : > { %228 = vadd.xlane.f32.xlu0 %v227_v29 }
  0x64   : > { %237 = vadd.xlane.f32.xlu1 %v236_v34 }
  0x65   : > { %234 = vadd.xlane.f32.xlu0 %v233_v35 }
  0x68   : > { %243 = vadd.xlane.f32.xlu1 %v242_v40 }
  0x69   : > { %240 = vadd.xlane.f32.xlu0 %v239_v41  ;;  %v1551_v41 = vstv %s966_s19 }
  0x6c   : > { %249 = vadd.xlane.f32.xlu1 %v248_v46 }
  0x6d   : > { %246 = vadd.xlane.f32.xlu0 %v245_v47 }
  0xdd   : > { %v211_v51 = vpop.xlane.xlu1 %210 }
  0xde   : > { %v255_v52 = vmul.f32 0.00390625, %v211_v51  ;;  %v208_v53 = vpop.xlane.xlu0 %207 }
  0xdf   : > { %v1530_v54 = vmul.f32 0.00390625, %v208_v53 }
  0xe0   : > { %v288_v55 = vrot.slane %v255_v52, 7  ;;  %v469_v3 = vrot.slane %v255_v52, 1  ;;  %v437_v29 = vmul.f32 %v1536_v61, %v255_v52  ;;  %v1561_v52 = vadd.s32 1, %v286_v17 }
  0xe1   : > { %v287_v57 = vrot.slane %v1530_v54, 7  ;;  %v214_v58 = vpop.xlane.xlu1 %213  ;;  %v1846_v10 = vrot.slane %v1530_v54, 1 }
  0xe2   : > { %v256_v59 = vmul.f32 0.00390625, %v214_v58  ;;  %v253_v60 = vpop.xlane.xlu0 %252  ;;  %vm548_vm3 = vcmp.lt.s32.totalorder %v1561_v52, 128 }
  0xe3   : > { %v318_v62 = vsel %vm303_vm0, %v287_v57, %v288_v55  ;;  %v1541_v63 = vmul.f32 0.00390625, %v253_v60  ;;  %v499_v48 = vsel %vm484_vm1, %v1846_v10, %v469_v3 }
  0xe4   : > { %v403_v7 = vmul.f32 %v1533_v56, %v318_v62  ;;  %v289_v11 = vrot.slane %v256_v59, 7  ;;  %v470_v16 = vrot.slane %v256_v59, 1  ;;  %v438_v17 = vmul.f32 %v1536_v61, %v256_v59 }
  0xe5   : > { %v1847_v23 = vrot.slane %v1541_v63, 7  ;;  %v220_v28 = vpop.xlane.xlu1 %219 }
  0xe6   : > { %v317_v34 = vsel %vm303_vm0, %v288_v55, %v289_v11  ;;  %v258_v35 = vmul.f32 0.00390625, %v220_v28  ;;  %v217_v40 = vpop.xlane.xlu0 %216  ;;  %v498_v46 = vsel %vm484_vm1, %v469_v3, %v470_v16  ;;  %v453_v47 = vadd.f32 %v437_v29, %v403_v7 }
  0xe7   : > { %v584_v49 = vmul.f32 %v1551_v41, %v498_v46  ;;  %v404_v51 = vmul.f32 %v1533_v56, %v317_v34  ;;  %v319_v53 = vsel %vm303_vm0, %v1847_v23, %v287_v57  ;;  %v257_v7 = vmul.f32 0.00390625, %v217_v40 }
  0xe8   : > { %v291_v60 = vrot.slane %v258_v35, 7  ;;  %v472_v62 = vrot.slane %v258_v35, 1  ;;  %v1569_v3 = vmul.f32 %v1536_v61, %v1530_v54  ;;  %v1572_v29 = vmul.f32 %v1551_v41, %v499_v48 }
  0xe9   : > { %v226_v55 = vpop.xlane.xlu1 %225  ;;  %v600_v58 = vadd.f32 %v584_v49, %v453_v47  ;;  %v290_v10 = vrot.slane %v257_v7, 7  ;;  %v471_v57 = vrot.slane %v257_v7, 1  ;;  %v454_v47 = vadd.f32 %v438_v17, %v404_v51 }
  0xea   : > { %v223_v28 = vpop.xlane.xlu0 %222  ;;  %v1575_v34 = vmul.f32 0.00390625, %v226_v55  ;;  %v1578_v49 = vsel %vm336_vm2, %v319_v53, 0.0  ;;  %v440_v40 = vmul.f32 %v1536_v61, %v258_v35  ;;  %v439_v22 = vmul.f32 %v1536_v61, %v257_v7 }
  0xeb   : > { %v968_v46 = vmul.f32 -1.442695, %v600_v58  ;;  %v259_v23 = vmul.f32 0.00390625, %v223_v28  ;;  %v315_v48 = vsel %vm303_vm0, %v290_v10, %v291_v60  ;;  %v316_v59 = vsel %vm303_vm0, %v289_v11, %v290_v10 }
  0xec   : > { %v293_v9 = vrot.slane %v1575_v34, 7  ;;  %v496_v55 = vsel %vm484_vm1, %v471_v57, %v472_v62  ;;  %v405_v51 = vmul.f32 %v1533_v56, %v316_v59  ;;  %v497_v35 = vsel %vm484_vm1, %v470_v16, %v471_v57 }
  0xed   : > { %v232_v8 = vpop.xlane.xlu1 %231  ;;  %1054 = vpow2.f32 %v968_v46  ;;  %v474_v53 = vrot.slane %v1575_v34, 1  ;;  %v406_v58 = vmul.f32 %v1533_v56, %v315_v48  ;;  %v585_v28 = vmul.f32 %v1551_v41, %v497_v35 }
  0xee   : > { %v442_v17 = vmul.f32 %v1536_v61, %v1575_v34  ;;  %v292_v10 = vrot.slane %v259_v23, 7  ;;  %v229_v11 = vpop.xlane.xlu0 %228  ;;  %v455_v46 = vadd.f32 %v439_v22, %v405_v51  ;;  %v586_v4 = vmul.f32 %v1551_v41, %v496_v55 }
  0xef   : > { %v441_v59 = vmul.f32 %v1536_v61, %v259_v23  ;;  %v473_v7 = vrot.slane %v259_v23, 1  ;;  %v601_v2 = vadd.f32 %v585_v28, %v454_v47  ;;  %v1603_v48 = vmul.f32 0.00390625, %v232_v8 }
  0xf0   : > { %v313_v16 = vsel %vm303_vm0, %v292_v10, %v293_v9  ;;  %v314_v57 = vsel %vm303_vm0, %v291_v60, %v292_v10  ;;  %v602_v43 = vadd.f32 %v586_v4, %v455_v46  ;;  %v456_v22 = vadd.f32 %v440_v40, %v406_v58 }
  0xf1   : > { %v238_v35 = vpop.xlane.xlu1 %237  ;;  %v407_v34 = vmul.f32 %v1533_v56, %v314_v57  ;;  %v408_v51 = vmul.f32 %v1533_v56, %v313_v16  ;;  %v494_v55 = vsel %vm484_vm1, %v473_v7, %v474_v53  ;;  %v969_v23 = vmul.f32 -1.442695, %v601_v2 }
  0xf2   : > { %v495_v47 = vsel %vm484_vm1, %v472_v62, %v473_v7  ;;  %v588_v28 = vmul.f32 %v1551_v41, %v494_v55  ;;  %v970_v42 = vmul.f32 -1.442695, %v602_v43  ;;  %v295_v4 = vrot.slane %v1603_v48, 7  ;;  %v235_v57 = vpop.xlane.xlu0 %234 }
  0xf3   : > { %v457_v60 = vadd.f32 %v441_v59, %v407_v34  ;;  %v587_v8 = vmul.f32 %v1551_v41, %v495_v47  ;;  %1056 = vpow2.f32 %v969_v23  ;;  %v458_v10 = vadd.f32 %v442_v17, %v408_v51 }
  0xf4   : > { %v476_v46 = vrot.slane %v1603_v48, 1  ;;  %v261_v16 = vmul.f32 0.00390625, %v229_v11  ;;  %1058 = vpow2.f32 %v970_v42  ;;  %v444_v62 = vmul.f32 %v1536_v61, %v1603_v48 }
  0xf5   : > { %v603_v40 = vadd.f32 %v587_v8, %v456_v22  ;;  %v604_v2 = vadd.f32 %v588_v28, %v457_v60  ;;  %v1618_v34 = vmul.f32 0.00390625, %v238_v35  ;;  %v244_v55 = vpop.xlane.xlu1 %243  ;;  %v263_v47 = vmul.f32 0.00390625, %v235_v57 }
  0xf6   : > { %v294_v7 = vrot.slane %v261_v16, 7  ;;  %v443_v43 = vmul.f32 %v1536_v61, %v261_v16  ;;  %v475_v59 = vrot.slane %v261_v16, 1  ;;  %v1633_v8 = vmul.f32 %v1536_v61, %v1541_v63 }
  0xf7   : > { %v1055_v58 = vpop.eup %1054  ;;  %v971_v17 = vmul.f32 -1.442695, %v603_v40  ;;  %v972_v51 = vmul.f32 -1.442695, %v604_v2  ;;  %v297_v16 = vrot.slane %v1618_v34, 7  ;;  %v402_v57 = vmul.f32 %v1533_v56, %v1578_v49 }
  0xf8   : > { %v664_v23 = vadd.f32 1.0, %v1055_v58  ;;  %v311_v42 = vsel %vm303_vm0, %v294_v7, %v295_v4  ;;  %v312_v11 = vsel %vm303_vm0, %v293_v9, %v294_v7  ;;  %v492_v48 = vsel %vm484_vm1, %v475_v59, %v476_v46  ;;  %v241_v58 = vpop.xlane.xlu0 %240 }
  0xf9   : > { %v493_v22 = vsel %vm484_vm1, %v474_v53, %v475_v59  ;;  %v409_v35 = vmul.f32 %v1533_v56, %v312_v11  ;;  %v410_v28 = vmul.f32 %v1533_v56, %v311_v42  ;;  %v590_v9 = vmul.f32 %v1551_v41, %v492_v48 }
  0xfa   : > { %1060 = vrcp.f32 %v664_v23  ;;  %v589_v60 = vmul.f32 %v1551_v41, %v493_v22  ;;  %v483_v53 = vrot.slane %v1541_v63, 1  ;;  %v478_v59 = vrot.slane %v1618_v34, 1 }
  0xfb   : > { %1062 = vpow2.f32 %v971_v17  ;;  %v459_v40 = vadd.f32 %v443_v43, %v409_v35  ;;  %v460_v7 = vadd.f32 %v444_v62, %v410_v28  ;;  %v296_v23 = vrot.slane %v263_v47, 7  ;;  %v250_v17 = vpop.xlane.xlu1 %249 }
  0xfc   : > { %v605_v2 = vadd.f32 %v589_v60, %v458_v10  ;;  %1064 = vpow2.f32 %v972_v51  ;;  %v445_v48 = vmul.f32 %v1536_v61, %v263_v47  ;;  %v477_v22 = vrot.slane %v263_v47, 1 }
  0xfd   : > { %v606_v42 = vadd.f32 %v590_v9, %v459_v40  ;;  %v1057_v45 = vpop.eup %1056  ;;  %v309_v49 = vsel %vm303_vm0, %v296_v23, %v297_v16  ;;  %v310_v10 = vsel %vm303_vm0, %v295_v4, %v296_v23  ;;  %v1647_v43 = vmul.f32 0.00390625, %v244_v55 }
  0xfe   : > { %v973_v11 = vmul.f32 -1.442695, %v605_v2  ;;  %v265_v51 = vmul.f32 0.00390625, %v241_v58  ;;  %v1059_v62 = vpop.eup %1058  ;;  %v665_v35 = vadd.f32 1.0, %v1057_v45  ;;  %v411_v28 = vmul.f32 %v1533_v56, %v310_v10 }
  0xff   : > { %v1650_v60 = vmul.f32 0.00390625, %v250_v17  ;;  %v666_v9 = vadd.f32 1.0, %v1059_v62  ;;  %v974_v40 = vmul.f32 -1.442695, %v606_v42  ;;  %v490_v47 = vsel %vm484_vm1, %v477_v22, %v478_v59 }
 0x100   : > { %1066 = vpow2.f32 %v973_v11  ;;  %v491_v2 = vsel %vm484_vm1, %v476_v46, %v477_v22  ;;  %v461_v4 = vadd.f32 %v445_v48, %v411_v28  ;;  %v592_v58 = vmul.f32 %v1551_v41, %v490_v47 }
 0x101   : > { %1068 = vrcp.f32 %v665_v35  ;;  %v591_v55 = vmul.f32 %v1551_v41, %v491_v2  ;;  %v452_v45 = vadd.f32 %v1569_v3, %v402_v57  ;;  %v1872_v23 = vrot.slane %v1530_v54, 1 }
 0x102   : > { %v446_v42 = vmul.f32 %v1536_v61, %v1618_v34  ;;  %v412_v46 = vmul.f32 %v1533_v56, %v309_v49  ;;  %1070 = vrcp.f32 %v666_v9  ;;  %v608_v22 = vadd.f32 %v592_v58, %v461_v4 }
 0x103   : > { %v500_v17 = vsel %vm484_vm1, %v483_v53, %v1872_v23  ;;  %v607_v48 = vadd.f32 %v591_v55, %v460_v7  ;;  %v480_v10 = vrot.slane %v1647_v43, 1  ;;  %1072 = vpow2.f32 %v974_v40 }
 0x104   : > { %v1061_v11 = vpop.eup %1060  ;;  %v298_v3 = vrot.slane %v265_v51, 7  ;;  %v479_v54 = vrot.slane %v265_v51, 1  ;;  %v301_v57 = vrot.slane %v1650_v60, 7  ;;  %v299_v47 = vrot.slane %v1647_v43, 7 }
 0x105   : > { %v1063_v62 = vpop.eup %1062  ;;  %718 = vperm.xlu1 %1052, %v1061_v11   ;;  %v975_v28 = vmul.f32 -1.442695, %v607_v48  ;;  %v447_v34 = vmul.f32 %v1536_v61, %v265_v51  ;;  %v462_v2 = vadd.f32 %v446_v42, %v412_v46  ;;  %v976_v9 = vmul.f32 -1.442695, %v608_v22  ;;  %v247_v11 = vpop.xlane.xlu0 %246 }
 0x106   : > { %v667_v35 = vadd.f32 1.0, %v1063_v62  ;;  %v1065_v49 = vpop.eup %1064  ;;  %v308_v7 = vsel %vm303_vm0, %v297_v16, %v298_v3  ;;  %v488_v40 = vsel %vm484_vm1, %v479_v54, %v480_v10  ;;  %v580_v4 = vsel %vm548_vm3, %v500_v17, 0.0 }
 0x107   : > { %v599_v55 = vadd.f32 %v1572_v29, %v452_v45  ;;  %v413_v58 = vmul.f32 %v1533_v56, %v308_v7  ;;  %v489_v51 = vsel %vm484_vm1, %v478_v59, %v479_v54  ;;  %v594_v16 = vmul.f32 %v1551_v41, %v488_v40 }
 0x108   : > { %1074 = vrcp.f32 %v667_v35  ;;  %v593_v23 = vmul.f32 %v1551_v41, %v489_v51  ;;  %v1873_v42 = vrot.slane %v1541_v63, 7  ;;  %v668_v17 = vadd.f32 1.0, %v1065_v49 }
 0x109   : > { %1076 = vpow2.f32 %v975_v28  ;;  %v307_v29 = vsel %vm303_vm0, %v298_v3, %v299_v47  ;;  %v463_v45 = vadd.f32 %v447_v34, %v413_v58  ;;  %v598_v59 = vmul.f32 %v1551_v41, %v580_v4 }
 0x10a   : > { %v304_v46 = vsel %vm303_vm0, %v301_v57, %v1873_v42  ;;  %v1067_v52 = vpop.eup %1066  ;;  %1078 = vpow2.f32 %v976_v9  ;;  %v609_v48 = vadd.f32 %v593_v23, %v462_v2  ;;  %v967_v54 = vmul.f32 -1.442695, %v599_v55 }
 0x10b   : > { %v417_v22 = vmul.f32 %v1533_v56, %v304_v46  ;;  %v1069_v62 = vpop.eup %1068  ;;  %v610_v35 = vadd.f32 %v594_v16, %v463_v45  ;;  %v482_v7 = vrot.slane %v1650_v60, 1  ;;  %v267_v40 = vmul.f32 0.00390625, %v247_v11 }
 0x10c   : > { %v448_v49 = vmul.f32 %v1536_v61, %v1647_v43  ;;  %v414_v28 = vmul.f32 %v1533_v56, %v307_v29  ;;  %v977_v51 = vmul.f32 -1.442695, %v609_v48  ;;  %v450_v3 = vmul.f32 %v1536_v61, %v1650_v60  ;;  %723 = vperm.xlu1 %1052, %v1069_v62   ;;  %v1071_v34 = vpop.eup %1070 }
 0x10d   : > { %1080 = vrcp.f32 %v668_v17  ;;  %v669_v2 = vadd.f32 1.0, %v1067_v52  ;;  %v978_v9 = vmul.f32 -1.442695, %v610_v35  ;;  %v300_v4 = vrot.slane %v267_v40, 7  ;;  %v1073_v55 = vpop.eup %1072 }
 0x10e   : > { %1082 = vpow2.f32 %v977_v51  ;;  %v467_v58 = vadd.f32 %v1633_v8, %v417_v22  ;;  %v449_v23 = vmul.f32 %v1536_v61, %v267_v40  ;;  %v481_v16 = vrot.slane %v267_v40, 1 }
 0x10f   : > { %1084 = vpow2.f32 %v978_v9  ;;  %v485_v42 = vsel %vm484_vm1, %v482_v7, %v483_v53  ;;  %v305_v60 = vsel %vm303_vm0, %v300_v4, %v301_v57  ;;  %v306_v46 = vsel %vm303_vm0, %v299_v47, %v300_v4 }
 0x110   : > { %v464_v11 = vadd.f32 %v448_v49, %v414_v28  ;;  %v415_v52 = vmul.f32 %v1533_v56, %v306_v46  ;;  %v416_v8 = vmul.f32 %v1533_v56, %v305_v60  ;;  %v486_v61 = vsel %vm484_vm1, %v481_v16, %v482_v7  ;;  %728 = vperm.xlu1 %1052, %v1071_v34  }
 0x111   : > { %v670_v17 = vadd.f32 1.0, %v1073_v55  ;;  %1086 = vrcp.f32 %v669_v2  ;;  %v487_v63 = vsel %vm484_vm1, %v480_v10, %v481_v16  ;;  %v596_v53 = vmul.f32 %v1551_v41, %v486_v61 }
 0x112   : > { %v1075_v57 = vpop.eup %1074  ;;  %v597_v47 = vmul.f32 %v1551_v41, %v485_v42  ;;  %v465_v29 = vadd.f32 %v449_v23, %v415_v52  ;;  %v466_v45 = vadd.f32 %v450_v3, %v416_v8  ;;  %v595_v56 = vmul.f32 %v1551_v41, %v487_v63 }
 0x113   : > { %v1077_v48 = vpop.eup %1076  ;;  %1088 = vpow2.f32 %v967_v54  ;;  %v614_v22 = vadd.f32 %v598_v59, %v467_v58 }
 0x114   : > { %v1079_v62 = vpop.eup %1078  ;;  %v671_v35 = vadd.f32 1.0, %v1077_v48  ;;  %v611_v7 = vadd.f32 %v595_v56, %v464_v11  ;;  %v612_v40 = vadd.f32 %v596_v53, %v465_v29  ;;  %v613_v43 = vadd.f32 %v597_v47, %v466_v45  ;;  %733 = vperm.xlu1 %1052, %v1075_v57  }
 0x115   : > { %1090 = vrcp.f32 %v670_v17  ;;  %v672_v50 = vadd.f32 1.0, %v1079_v62  ;;  %v982_v3 = vmul.f32 -1.442695, %v614_v22 }
 0x116   : > { %1092 = vrcp.f32 %v671_v35  ;;  %v979_v10 = vmul.f32 -1.442695, %v611_v7  ;;  %v980_v49 = vmul.f32 -1.442695, %v612_v40  ;;  %v981_v28 = vmul.f32 -1.442695, %v613_v43 }
 0x117   : > { %v1081_v51 = vpop.eup %1080  ;;  %1094 = vrcp.f32 %v672_v50 }
 0x118   : > { %v1083_v34 = vpop.eup %1082  ;;  %1096 = vpow2.f32 %v979_v10  ;;  %738 = vperm.xlu1 %1052, %v1081_v51  }
 0x119   : > { %v1085_v41 = vpop.eup %1084  ;;  %v673_v59 = vadd.f32 1.0, %v1083_v34  ;;  %1098 = vpow2.f32 %v980_v49 }
 0x11a   : > { %v674_v54 = vadd.f32 1.0, %v1085_v41  ;;  %1100 = vpow2.f32 %v981_v28 }
 0x11b   : > { %v1087_v2 = vpop.eup %1086  ;;  %1102 = vpow2.f32 %v982_v3 }
 0x11c   : > { %1104 = vrcp.f32 %v674_v54  ;;  %743 = vperm.xlu1 %1052, %v1087_v2   ;;  %v1874_v2 = vld [vmem:[#allocation17_spill] sm:$0xff] }
 0x11d   : > { %v1089_v9 = vpop.eup %1088  ;;  %1106 = vrcp.f32 %v673_v59 }
 0x11e   : > { %v663_v61 = vadd.f32 1.0, %v1089_v9 }
 0x11f   : > { %v1091_v4 = vpop.eup %1090 }
 0x120   : > { %v1093_v55 = vpop.eup %1092  ;;  %748 = vperm.xlu1 %1052, %v1091_v4   ;;  %v1875_v4 = vld [vmem:[#allocation15_spill] sm:$0xff] }
 0x121   : > { %v1095_v58 = vpop.eup %1094 }
 0x122   : > { %v1097_v23 = vpop.eup %1096  ;;  %758 = vperm.xlu0 %1053, %v1095_v58  }
 0x123   : > { %v1099_v16 = vpop.eup %1098  ;;  %v675_v42 = vadd.f32 1.0, %v1097_v23 }
 0x124   : > { %v1101_v60 = vpop.eup %1100  ;;  %v676_v46 = vadd.f32 1.0, %v1099_v16  ;;  %753 = vperm.xlu1 %1052, %v1093_v55  }
 0x125   : > { %v1103_v11 = vpop.eup %1102  ;;  %v677_v52 = vadd.f32 1.0, %v1101_v60  ;;  %1108 = vrcp.f32 %v675_v42  ;;  %v1879_v60 = vld [vmem:[#allocation13_spill] sm:$0xff] }
 0x126   : > { %v1105_v8 = vpop.eup %1104  ;;  %1110 = vrcp.f32 %v676_v46  ;;  %v678_v63 = vadd.f32 1.0, %v1103_v11  ;;  %v1880_v11 = vld [vmem:[#allocation14_spill] sm:$0xff] }
 0x127   : > { %v1107_v17 = vpop.eup %1106  ;;  %768 = vperm.xlu0 %1053, %v1105_v8   ;;  %1112 = vrcp.f32 %v677_v52 }
 0x128   : > { %763 = vperm.xlu1 %1052, %v1107_v17   ;;  %1114 = vrcp.f32 %v663_v61 }
 0x129   : > { %1116 = vrcp.f32 %v678_v63 }
 0x12f   : > { %v1109_v53 = vpop.eup %1108 }
 0x130   : > { %v1111_v57 = vpop.eup %1110  ;;  %773 = vperm.xlu1 %1052, %v1109_v53  }
 0x131   : > { %778 = vperm.xlu0 %1053, %v1111_v57   ;;  %v1113_v47 = vpop.eup %1112 }
 0x132   : > { %v1115_v29 = vpop.eup %1114 }
 0x133   : > { %v1117_v45 = vpop.eup %1116 }
 0x134   : > { %783 = vperm.xlu1 %1052, %v1113_v47  }
 0x135   : > { %713 = vperm.xlu0 %1053, %v1115_v29  }
 0x139   : > { %788 = vperm.xlu0 %1053, %v1117_v45  }
 0x184   : > { %v719_v56 = vpop.permute.xlu1 %718 }
 0x185   : > { %v793_v48 = vmul.f32 %v719_v56, %v1401_v0  ;;  %v794_v22 = vmul.f32 %v719_v56, %v1404_v1 }
 0x187   : > { %825 = vst [vmem:[%s1725_s29 + $0x10] sm:$0xff] %v793_v48  ;;  %826 = vst [vmem:[%s1725_s29 + $0x18] sm:$0xff] %v794_v22 }
 0x18b   : > { %v724_v62 = vpop.permute.xlu1 %723 }
 0x18c   : > { %v795_v35 = vmul.f32 %v724_v62, %v1415_v5  ;;  %v796_v0 = vmul.f32 %v724_v62, %v1418_v6 }
 0x18e   : > { %827 = vst [vmem:[%s1725_s29 + $0x20] sm:$0xff] %v795_v35  ;;  %828 = vst [vmem:[%s1725_s29 + $0x28] sm:$0xff] %v796_v0 }
 0x18f   : > { %v729_v1 = vpop.permute.xlu1 %728 }
 0x190   : > { %v797_v7 = vmul.f32 %v729_v1, %v1439_v14  ;;  %v798_v40 = vmul.f32 %v729_v1, %v1442_v15 }
 0x192   : > { %829 = vst [vmem:[%s1725_s29 + $0x30] sm:$0xff] %v797_v7  ;;  %830 = vst [vmem:[%s1725_s29 + $0x38] sm:$0xff] %v798_v40 }
 0x193   : > { %v734_v43 = vpop.permute.xlu1 %733 }
 0x194   : > { %v799_v50 = vmul.f32 %v734_v43, %v1433_v12  ;;  %v800_v5 = vmul.f32 %v734_v43, %v1436_v13 }
 0x196   : > { %831 = vst [vmem:[%s1725_s29 + $0x40] sm:$0xff] %v799_v50  ;;  %832 = vst [vmem:[%s1725_s29 + $0x48] sm:$0xff] %v800_v5 }
 0x197   : > { %v739_v6 = vpop.permute.xlu1 %738 }
 0x198   : > { %v801_v10 = vmul.f32 %v739_v6, %v1455_v20  ;;  %v802_v14 = vmul.f32 %v739_v6, %v1458_v21 }
 0x19a   : > { %833 = vst [vmem:[%s1725_s29 + $0x50] sm:$0xff] %v801_v10  ;;  %834 = vst [vmem:[%s1725_s29 + $0x58] sm:$0xff] %v802_v14 }
 0x19b   : > { %v744_v15 = vpop.permute.xlu1 %743 }
 0x19c   : > { %v803_v49 = vmul.f32 %v744_v15, %v1449_v18  ;;  %v804_v12 = vmul.f32 %v744_v15, %v1452_v19 }
 0x19e   : > { %835 = vst [vmem:[%s1725_s29 + $0x60] sm:$0xff] %v803_v49  ;;  %836 = vst [vmem:[%s1725_s29 + $0x68] sm:$0xff] %v804_v12 }
 0x19f   : > { %v749_v13 = vpop.permute.xlu1 %748 }
 0x1a0   : > { %v805_v28 = vmul.f32 %v749_v13, %v1471_v26  ;;  %v806_v20 = vmul.f32 %v749_v13, %v1474_v27 }
 0x1a1   : > { %v759_v51 = vpop.permute.xlu0 %758 }
 0x1a2   : > { %v809_v21 = vmul.f32 %v759_v51, %v1487_v32  ;;  %v810_v3 = vmul.f32 %v759_v51, %v1490_v33  ;;  %837 = vst [vmem:[%s1725_s29 + $0x70] sm:$0xff] %v805_v28  ;;  %838 = vst [vmem:[%s1725_s29 + $0x78] sm:$0xff] %v806_v20 }
 0x1a3   : > { %v754_v18 = vpop.permute.xlu1 %753 }
 0x1a4   : > { %841 = vst [vmem:[%s1725_s29 + $0x90] sm:$0xff] %v809_v21  ;;  %842 = vst [vmem:[%s1725_s29 + $0x98] sm:$0xff] %v810_v3  ;;  %v807_v19 = vmul.f32 %v754_v18, %v1465_v24  ;;  %v808_v26 = vmul.f32 %v754_v18, %v1468_v25 }
 0x1a6   : > { %v769_v34 = vpop.permute.xlu0 %768  ;;  %839 = vst [vmem:[%s1725_s29 + $0x80] sm:$0xff] %v807_v19  ;;  %840 = vst [vmem:[%s1725_s29 + $0x88] sm:$0xff] %v808_v26 }
 0x1a7   : > { %v813_v27 = vmul.f32 %v769_v34, %v1503_v38  ;;  %v814_v32 = vmul.f32 %v769_v34, %v1506_v39  ;;  %v764_v33 = vpop.permute.xlu1 %763 }
 0x1a8   : > { %v811_v41 = vmul.f32 %v764_v33, %v1481_v30  ;;  %v812_v59 = vmul.f32 %v764_v33, %v1484_v31 }
 0x1a9   : > { %845 = vst [vmem:[%s1725_s29 + $0xb0] sm:$0xff] %v813_v27  ;;  %846 = vst [vmem:[%s1725_s29 + $0xb8] sm:$0xff] %v814_v32 }
 0x1aa   : > { %843 = vst [vmem:[%s1725_s29 + $0xa0] sm:$0xff] %v811_v41  ;;  %844 = vst [vmem:[%s1725_s29 + $0xa8] sm:$0xff] %v812_v59 }
 0x1af   : > { %v774_v24 = vpop.permute.xlu1 %773 }
 0x1b0   : > { %v779_v25 = vpop.permute.xlu0 %778  ;;  %v815_v38 = vmul.f32 %v774_v24, %v1497_v36  ;;  %v816_v39 = vmul.f32 %v774_v24, %v1500_v37  ;;  %v1876_v36 = vld [vmem:[#allocation16_spill] sm:$0xff]  ;;  %v1877_v37 = vld [vmem:[#allocation11_spill] sm:$0xff] }
 0x1b1   : > { %v817_v54 = vmul.f32 %v779_v25, %v1519_v44  ;;  %v818_v30 = vmul.f32 %v779_v25, %v1874_v2  ;;  %v1878_v44 = vld [vmem:[#allocation12_spill] sm:$0xff] }
 0x1b2   : > { %847 = vst [vmem:[%s1725_s29 + $0xc0] sm:$0xff] %v815_v38  ;;  %848 = vst [vmem:[%s1725_s29 + $0xc8] sm:$0xff] %v816_v39 }
 0x1b3   : > { %849 = vst [vmem:[%s1725_s29 + $0xd0] sm:$0xff] %v817_v54  ;;  %850 = vst [vmem:[%s1725_s29 + $0xd8] sm:$0xff] %v818_v30  ;;  %v784_v31 = vpop.permute.xlu1 %783 }
 0x1b4   : > { %v714_v9 = vpop.permute.xlu0 %713  ;;  %v819_v55 = vmul.f32 %v784_v31, %v1875_v4  ;;  %v820_v58 = vmul.f32 %v784_v31, %v1876_v36 }
 0x1b5   : > { %v791_v23 = vmul.f32 %v714_v9, %v1877_v37  ;;  %v792_v16 = vmul.f32 %v714_v9, %v1878_v44 }
 0x1b6   : > { %851 = vst [vmem:[%s1725_s29 + $0xe0] sm:$0xff] %v819_v55  ;;  %852 = vst [vmem:[%s1725_s29 + $0xe8] sm:$0xff] %v820_v58 }
 0x1b7   : > { %823 = vst [vmem:[%s1725_s29] sm:$0xff] %v791_v23  ;;  %824 = vst [vmem:[%s1725_s29 + $0x8] sm:$0xff] %v792_v16 }
 0x1b8   : > { %v789_v42 = vpop.permute.xlu0 %788 }
 0x1b9   : > { %v821_v46 = vmul.f32 %v789_v42, %v1879_v60  ;;  %v822_v52 = vmul.f32 %v789_v42, %v1880_v11 }
 0x1bb   : > { %853 = vst [vmem:[%s1725_s29 + $0xf0] sm:$0xff] %v821_v46  ;;  %854 = vst [vmem:[%s1725_s29 + $0xf8] sm:$0xff] %v822_v52 }
 0x1bc   : > { %1174 = shalt.err (!%p1171_p0)
}
 0x1bd   : > { %s1175_s16 = scalar_lea.hbm %s1790_s7, 4096  ;;  %s1179_s25 = scalar_lea.hbm %s1842_s2, 8192 }
 0x1be   : > { %p1176_p8 = scmp.ne.s32.totalorder %s1790_s7, %s1175_s16  ;;  %p1180_p1 = scmp.lt.u32.totalorder %s1790_s7, %s1842_s2 }
 0x1bf   : > { %p1181_p2 = scmp.lt.u32.totalorder %s1179_s25, %s1175_s16  ;;  %p1183_p12 = scmp.lt.u32.totalorder %s1175_s16, %s1790_s7 }
 0x1c0   : > { %p1177_p9 = pnand %p1176_p8, %p1881_p13 }
 0x1c1   : > { %p1182_p11 = por %p1181_p2, %p1180_p1 }
 0x1c2   : > { %p1178_p10 = pneg %p1177_p9 }
 0x1c3   : > { %p1184_p7 = por %p1183_p12, %p1182_p11 }
 0x1c5   : > { %p1185_p3 = pnand %p1184_p7, %p1178_p10 }
 0x1c7   : > { %1188 = shalt.err (!%p1185_p3)
}
 0x1c8   : > { %s1239_s23 = smov 256   ;;  %s1240_s19 = smov 16  }
 0x1c9   : > { %996 = dma.vmem_to_hbm [thread:$0]  (%p1881_p13), %s1792_s4, 4096, %s1790_s7, %s856_s13, %s1239_s23, %s1239_s23, %s1240_s19  }
 0x1ca PF: > { %s884_s29 = sand.u32 1, %s1219_s9   ;;  %p1882_p6 = scmp.ne.s32.totalorder %s1858_s22, 0 }
 0x1cb   : > { %p1883_p4 = scmp.ge.s32.totalorder %s1231_s12, 2  ;;  %s885_s30 = scalar_lea.sflag [#allocation4], %s884_s29 }
 0x1cd   : > { %p1007_p5 = pnand %p1883_p4, %p1882_p6 }
 0x1cf   : > { %1214 = dma.done.wait (!%p1007_p5), %s885_s30, 4096  }
 0x1d0   : > { %1216 = vsyncadd (!%p1007_p5), %s885_s30, 4294963200  ;;  %p16_p0 = scmp.ge.s32.totalorder %s1281_s15, 4   ;;  %s1884_s9 = smov %s1223_s10 }
 0x1d1   : > { %s1885_s10 = smov %s1227_s11  ;;  %s1886_s11 = smov %s1293_s18 }
 0x1d2   : > { %s1887_s12 = smov %s1281_s15  ;;  %18 = sbr.rel (!%p16_p0) target bundleno = 6 (0x6), region = 78 }
 0x1d9   :  { %890 = vsyncpa [#allocation3], 1 }
 0x1da   :  { %892 = vsyncpa [#allocation3 + $0x1], 1 }
 0x1db   :  { %893 = vsyncpa [#allocation4], 1 }
 0x1dc   :  { %895 = vsyncpa [#allocation4 + $0x1], 1 }
 0x1dd   :  { %896 = vsyncpa [#allocation5], 1 }
 0x1de   :  { %898 = vsyncpa [#allocation5 + $0x1], 1 }

</bundles_post_ra>
